<compile_context>
chip_gen: v7x
topology: tpu7x:2x2x1
jax: 0.10.0
libtpu: 0.0.40
codegen_flags: <defaults>
</compile_context>

<pallas_src>
import functools
import math

import jax
import jax.numpy as jnp
import numpy as np
from jax.experimental import pallas as pl
from jax.experimental.pallas import tpu as pltpu


_U = jnp.uint32
# Exact mean / 1/std of a sum of 8 independent uniform bytes (CLT normal).
_CLT_MEAN = 8 * 255.0 / 2.0                                   # 1020.0
_CLT_INV_STD = 1.0 / math.sqrt(8.0 * (256.0 ** 2 - 1.0) / 12.0)


def _hash_u32(x):
    """lowbias32-style integer hash: VPU-only mul/xor/shift, good avalanche."""
    x = x * _U(0x9E3779B9)                # Weyl spread of the counter
    x = (x ^ (x >> 16)) * _U(0x7FEB352D)
    x = (x ^ (x >> 15)) * _U(0x846CA68B)
    x = x ^ (x >> 16)
    return x


def _byte_sum(w):
    return ((w & _U(0xFF)) + ((w >> 8) & _U(0xFF))
            + ((w >> 16) & _U(0xFF)) + (w >> 24))


def _randn_kernel(seed_ref, out_ref):
    tb, d = out_ref.shape
    # Unique global flat counter per output element -> tiles are decorrelated
    # and independent of execution order (safe under "parallel").
    row = jax.lax.broadcasted_iota(jnp.int32, (tb, d), 0).astype(jnp.uint32)
    col = jax.lax.broadcasted_iota(jnp.int32, (tb, d), 1).astype(jnp.uint32)
    base = (pl.program_id(0) * tb).astype(jnp.uint32)
    g = (row + base) * _U(d) + col

    # Mix the seed once (scalar), then draw two hashed words per element.
    s = _hash_u32(seed_ref[0].astype(jnp.uint32) + _U(0x632BE59B))
    c = g * _U(2) + s
    w0 = _hash_u32(c)
    w1 = _hash_u32(c + _U(1))

    # CLT over 8 uniform bytes -> ~N(0,1) with exact mean 0 / std 1.
    total = (_byte_sum(w0) + _byte_sum(w1)).astype(jnp.float32)
    out_ref[...] = (total - _CLT_MEAN) * _CLT_INV_STD


def _row_tile(rows: int) -> int:
    """Pick a row tile: full block when small, else >=2 even, 8-aligned tiles."""
    if rows <= 1024:
        return rows                          # single full-extent block
    max_tb = 8192                            # 8 MiB/buffer at D=256 f32
    n_tiles = max(2, -(-rows // max_tb))     # >= 2 tiles so both v7x TCs work
    if n_tiles % 2:
        n_tiles += 1                         # even tile count -> balanced split
    tb = -(-rows // n_tiles)
    tb = ((tb + 7) // 8) * 8                 # sublane-aligned (multiple of 8)
    return min(tb, rows)


@functools.partial(jax.jit, static_argnames=("repr_dim",))
def mock_model_forward(states, actions, seed, *, repr_dim=256):
    """MockModel.forward: returns randn((B, T+1, repr_dim)).

    `states` / `actions` only define the output shape (exactly like the
    PyTorch module); they are deliberately not passed to the kernel.
    """
    del states  # unused by MockModel.forward (shape contract only)
    B, T, _ = actions.shape
    rows = B * (T + 1)
    D = repr_dim  # 256 = 2*128 -> lane-dense, unmasked full-width stores

    TB = _row_tile(rows)
    grid = (pl.cdiv(rows, TB),)

    out_flat = pl.pallas_call(
        _randn_kernel,
        out_shape=jax.ShapeDtypeStruct((rows, D), jnp.float32),
        grid_spec=pltpu.PrefetchScalarGridSpec(
            num_scalar_prefetch=1,  # seed -> SMEM
            grid=grid,
            in_specs=[],
            out_specs=pl.BlockSpec((TB, D), lambda i, seed_ref: (i, 0)),
        ),
        compiler_params=pltpu.CompilerParams(
            # Row tiles are independent -> shard across TensorCores on v7x.
            dimension_semantics=("parallel",),
        ),
        cost_estimate=pl.CostEstimate(
            flops=rows * D * 32,           # VPU integer hash + CLT work
            transcendentals=0,             # no EUP usage
            bytes_accessed=rows * D * 4,   # output stores only; zero input DMA
        ),
    )(seed)

    return out_flat.reshape(B, T + 1, D)


if __name__ == "__main__":
    # Small shapes consistent with the module's contract:
    #   states:  [B, T, Ch, H, W], actions: [B, T-1, 2]  ->  out: [B, T, 256]
    B, T_states, Ch, H, W = 2, 8, 4, 16, 16
    repr_dim = 256

    key = jax.random.PRNGKey(0)
    k_states, k_actions = jax.random.split(key)
    states = jax.random.normal(k_states, (B, T_states, Ch, H, W), jnp.float32)
    actions = jax.random.normal(k_actions, (B, T_states - 1, 2), jnp.float32)
    seed = jnp.array([0], dtype=jnp.int32)

    out = mock_model_forward(states, actions, seed, repr_dim=repr_dim)
    out = jax.block_until_ready(out)

    # torch.randn contract: correct shape, finite, ~N(0,1) samples.
    # (Exact values cannot match torch's RNG stream; distribution is checked.)
    assert out.shape == (B, T_states, repr_dim), out.shape
    arr = np.asarray(out)
    assert np.all(np.isfinite(arr))
    assert 0.5 < arr.std() < 1.5, arr.std()
    assert abs(arr.mean()) < 0.3, arr.mean()

    print("KERNEL_OK")
</pallas_src>

<mosaic_0001>
module attributes {stable_mosaic.version = 11 : i64} {
  func.func @_randn_kernel(%arg0: i32, %arg1: memref<1xi32, #tpu.memory_space<smem>>, %arg2: memref<16x256xf32, #tpu.memory_space<vmem>>) attributes {dimension_semantics = [#tpu.dimension_semantics<parallel>], iteration_bounds = array<i64: 1>, scalar_prefetch = 1 : i64, scratch_operands = 0 : i64, tpu.core_type = #tpu.core_type<tc>, window_params = [{transform_indices = @transform_0, window_bounds = array<i64: 16, 256>}]} {
    %0 = tpu.iota {dimensions = array<i32: 0>} : vector<16x256xi32>
    %1 = tpu.iota {dimensions = array<i32: 1>} : vector<16x256xi32>
    %c16_i32 = arith.constant 16 : i32
    %2 = arith.muli %arg0, %c16_i32 : i32
    %3 = vector.broadcast %2 : i32 to vector<16x256xi32>
    %4 = arith.addi %0, %3 : vector<16x256xi32>
    %c256_i32 = arith.constant 256 : i32
    %5 = vector.broadcast %c256_i32 : i32 to vector<16x256xi32>
    %6 = arith.muli %4, %5 : vector<16x256xi32>
    %7 = arith.addi %6, %1 : vector<16x256xi32>
    %c0 = arith.constant 0 : index
    %8 = memref.load %arg1[%c0] : memref<1xi32, #tpu.memory_space<smem>>
    %c1663821211_i32 = arith.constant 1663821211 : i32
    %9 = arith.addi %8, %c1663821211_i32 : i32
    %c-1640531527_i32 = arith.constant -1640531527 : i32
    %10 = arith.muli %9, %c-1640531527_i32 : i32
    %c16_i32_0 = arith.constant 16 : i32
    %11 = arith.shrui %10, %c16_i32_0 : i32
    %12 = arith.xori %10, %11 : i32
    %c2146121005_i32 = arith.constant 2146121005 : i32
    %13 = arith.muli %12, %c2146121005_i32 : i32
    %c15_i32 = arith.constant 15 : i32
    %14 = arith.shrui %13, %c15_i32 : i32
    %15 = arith.xori %13, %14 : i32
    %c-2073254261_i32 = arith.constant -2073254261 : i32
    %16 = arith.muli %15, %c-2073254261_i32 : i32
    %c16_i32_1 = arith.constant 16 : i32
    %17 = arith.shrui %16, %c16_i32_1 : i32
    %18 = arith.xori %16, %17 : i32
    %c2_i32 = arith.constant 2 : i32
    %19 = vector.broadcast %c2_i32 : i32 to vector<16x256xi32>
    %20 = arith.muli %7, %19 : vector<16x256xi32>
    %21 = vector.broadcast %18 : i32 to vector<16x256xi32>
    %22 = arith.addi %20, %21 : vector<16x256xi32>
    %c-1640531527_i32_2 = arith.constant -1640531527 : i32
    %23 = vector.broadcast %c-1640531527_i32_2 : i32 to vector<16x256xi32>
    %24 = arith.muli %22, %23 : vector<16x256xi32>
    %c16_i32_3 = arith.constant 16 : i32
    %25 = vector.broadcast %c16_i32_3 : i32 to vector<16x256xi32>
    %26 = arith.shrui %24, %25 : vector<16x256xi32>
    %27 = arith.xori %24, %26 : vector<16x256xi32>
    %c2146121005_i32_4 = arith.constant 2146121005 : i32
    %28 = vector.broadcast %c2146121005_i32_4 : i32 to vector<16x256xi32>
    %29 = arith.muli %27, %28 : vector<16x256xi32>
    %c15_i32_5 = arith.constant 15 : i32
    %30 = vector.broadcast %c15_i32_5 : i32 to vector<16x256xi32>
    %31 = arith.shrui %29, %30 : vector<16x256xi32>
    %32 = arith.xori %29, %31 : vector<16x256xi32>
    %c-2073254261_i32_6 = arith.constant -2073254261 : i32
    %33 = vector.broadcast %c-2073254261_i32_6 : i32 to vector<16x256xi32>
    %34 = arith.muli %32, %33 : vector<16x256xi32>
    %c16_i32_7 = arith.constant 16 : i32
    %35 = vector.broadcast %c16_i32_7 : i32 to vector<16x256xi32>
    %36 = arith.shrui %34, %35 : vector<16x256xi32>
    %37 = arith.xori %34, %36 : vector<16x256xi32>
    %c1_i32 = arith.constant 1 : i32
    %38 = vector.broadcast %c1_i32 : i32 to vector<16x256xi32>
    %39 = arith.addi %22, %38 : vector<16x256xi32>
    %c-1640531527_i32_8 = arith.constant -1640531527 : i32
    %40 = vector.broadcast %c-1640531527_i32_8 : i32 to vector<16x256xi32>
    %41 = arith.muli %39, %40 : vector<16x256xi32>
    %c16_i32_9 = arith.constant 16 : i32
    %42 = vector.broadcast %c16_i32_9 : i32 to vector<16x256xi32>
    %43 = arith.shrui %41, %42 : vector<16x256xi32>
    %44 = arith.xori %41, %43 : vector<16x256xi32>
    %c2146121005_i32_10 = arith.constant 2146121005 : i32
    %45 = vector.broadcast %c2146121005_i32_10 : i32 to vector<16x256xi32>
    %46 = arith.muli %44, %45 : vector<16x256xi32>
    %c15_i32_11 = arith.constant 15 : i32
    %47 = vector.broadcast %c15_i32_11 : i32 to vector<16x256xi32>
    %48 = arith.shrui %46, %47 : vector<16x256xi32>
    %49 = arith.xori %46, %48 : vector<16x256xi32>
    %c-2073254261_i32_12 = arith.constant -2073254261 : i32
    %50 = vector.broadcast %c-2073254261_i32_12 : i32 to vector<16x256xi32>
    %51 = arith.muli %49, %50 : vector<16x256xi32>
    %c16_i32_13 = arith.constant 16 : i32
    %52 = vector.broadcast %c16_i32_13 : i32 to vector<16x256xi32>
    %53 = arith.shrui %51, %52 : vector<16x256xi32>
    %54 = arith.xori %51, %53 : vector<16x256xi32>
    %c255_i32 = arith.constant 255 : i32
    %55 = vector.broadcast %c255_i32 : i32 to vector<16x256xi32>
    %56 = arith.andi %37, %55 : vector<16x256xi32>
    %c8_i32 = arith.constant 8 : i32
    %57 = vector.broadcast %c8_i32 : i32 to vector<16x256xi32>
    %58 = arith.shrui %37, %57 : vector<16x256xi32>
    %c255_i32_14 = arith.constant 255 : i32
    %59 = vector.broadcast %c255_i32_14 : i32 to vector<16x256xi32>
    %60 = arith.andi %58, %59 : vector<16x256xi32>
    %61 = arith.addi %56, %60 : vector<16x256xi32>
    %c16_i32_15 = arith.constant 16 : i32
    %62 = vector.broadcast %c16_i32_15 : i32 to vector<16x256xi32>
    %63 = arith.shrui %37, %62 : vector<16x256xi32>
    %c255_i32_16 = arith.constant 255 : i32
    %64 = vector.broadcast %c255_i32_16 : i32 to vector<16x256xi32>
    %65 = arith.andi %63, %64 : vector<16x256xi32>
    %66 = arith.addi %61, %65 : vector<16x256xi32>
    %c24_i32 = arith.constant 24 : i32
    %67 = vector.broadcast %c24_i32 : i32 to vector<16x256xi32>
    %68 = arith.shrui %37, %67 : vector<16x256xi32>
    %69 = arith.addi %66, %68 : vector<16x256xi32>
    %c255_i32_17 = arith.constant 255 : i32
    %70 = vector.broadcast %c255_i32_17 : i32 to vector<16x256xi32>
    %71 = arith.andi %54, %70 : vector<16x256xi32>
    %c8_i32_18 = arith.constant 8 : i32
    %72 = vector.broadcast %c8_i32_18 : i32 to vector<16x256xi32>
    %73 = arith.shrui %54, %72 : vector<16x256xi32>
    %c255_i32_19 = arith.constant 255 : i32
    %74 = vector.broadcast %c255_i32_19 : i32 to vector<16x256xi32>
    %75 = arith.andi %73, %74 : vector<16x256xi32>
    %76 = arith.addi %71, %75 : vector<16x256xi32>
    %c16_i32_20 = arith.constant 16 : i32
    %77 = vector.broadcast %c16_i32_20 : i32 to vector<16x256xi32>
    %78 = arith.shrui %54, %77 : vector<16x256xi32>
    %c255_i32_21 = arith.constant 255 : i32
    %79 = vector.broadcast %c255_i32_21 : i32 to vector<16x256xi32>
    %80 = arith.andi %78, %79 : vector<16x256xi32>
    %81 = arith.addi %76, %80 : vector<16x256xi32>
    %c24_i32_22 = arith.constant 24 : i32
    %82 = vector.broadcast %c24_i32_22 : i32 to vector<16x256xi32>
    %83 = arith.shrui %54, %82 : vector<16x256xi32>
    %84 = arith.addi %81, %83 : vector<16x256xi32>
    %85 = arith.addi %69, %84 : vector<16x256xi32>
    %86 = arith.uitofp %85 : vector<16x256xi32> to vector<16x256xf32>
    %cst = arith.constant 1.020000e+03 : f32
    %87 = vector.broadcast %cst : f32 to vector<16x256xf32>
    %88 = arith.subf %86, %87 : vector<16x256xf32>
    %cst_23 = arith.constant 0.00478419615 : f32
    %89 = vector.broadcast %cst_23 : f32 to vector<16x256xf32>
    %90 = arith.mulf %88, %89 : vector<16x256xf32>
    %c0_24 = arith.constant 0 : index
    %c0_25 = arith.constant 0 : index
    %91 = vector.load %arg2[%c0_24, %c0_25] : memref<16x256xf32, #tpu.memory_space<vmem>>, vector<16x256xf32>
    tpu.vector_store %arg2[%c0_24, %c0_25], %90 {strides = array<i32>} : memref<16x256xf32, #tpu.memory_space<vmem>>, vector<16x256xf32>,
    return
  }
  func.func @transform_0(%arg0: i32, %arg1: memref<1xi32, #tpu.memory_space<smem>>) -> (i32, i32) {
    %c0_i32 = arith.constant 0 : i32
    %c0_i32_0 = arith.constant 0 : i32
    return %arg0, %c0_i32 : i32, i32
  }
}

</mosaic_0001>

<bundles_post_ra>
// kernel: mock_model_forward.1
= control target key start
LH: loop header
LB: loop body
LE: loop exit
PB: predicated region body
PF: predicated region fallthrough
CT: control target
= control target key end

     0   :  { %v8_v0 = vlaneseq  ;;  %s322_s0 = inlined_call_operand.<no memory space> [shape: s32[1], index: 0, kind: input, shape index: {}]   ;;  %s323_s1 = inlined_call_operand.hbm [shape: f32[16,256], index: 1, kind: output, shape index: {}]  }
   0x1   :  { %s25_s8 = sadd.s32 1663821211, %s322_s0 }
   0x2   :  { %7 = vsyncpa [#allocation5], 0  ;;  %s26_s9 = smul.u32 2654435769, %s25_s8  ;;  %v9_v1 = vshrl.u32 %v8_v0, 7  ;;  %v12_v2 = vand.u32 127, %v8_v0 }
   0x3   :  { %s279_s17 = smov [#allocation4]  }
   0x4   :  { %s27_s10 = sshrl.u32 %s26_s9, 16  ;;  %v18_v3 = vmul.u32 256, %v9_v1  ;;  %v13_v4 = vadd.s32 128, %v12_v2  ;;  %v10_v5 = vadd.s32 8, %v9_v1  ;;  %s237_s18 = sshll.u32 %s279_s17, 4  ;;  %s238_s18 = int_to_ptr.vmem [resolvable:$true] %s237_s18 }
   0x5   :  { %s28_s11 = sxor.u32 %s27_s10, %s26_s9  ;;  %s255_s19 = scalar_lea.vmem %s238_s18, 512 }
   0x6   :  { %s29_s12 = smul.u32 2146121005, %s28_s11  ;;  %v20_v6 = vadd.s32 %v18_v3, %v12_v2  ;;  %v21_v7 = vadd.s32 %v18_v3, %v13_v4  ;;  %v19_v8 = vmul.u32 256, %v10_v5  ;;  %p256_p0 = scmp.ne.s32.totalorder %s238_s18, %s255_s19 }
   0x7   :  { %p260_p1 = scmp.lt.s32.totalorder %s238_s18, %s238_s18  ;;  %p261_p2 = scmp.lt.s32.totalorder %s255_s19, %s255_s19 }
   0x8   :  { %s30_s13 = sshrl.u32 %s29_s12, 15  ;;  %v22_v9 = vadd.s32 %v19_v8, %v12_v2  ;;  %v23_v10 = vadd.s32 %v19_v8, %v13_v4  ;;  %v35_v11 = vmul.u32 2, %v20_v6  ;;  %v36_v12 = vmul.u32 2, %v21_v7 }
   0x9   :  { %s31_s14 = sxor.u32 %s30_s13, %s29_s12  ;;  %p262_p3 = por %p261_p2, %p260_p1 }
   0xa   :  { %s32_s15 = smul.u32 2221713035, %s31_s14  ;;  %v37_v13 = vmul.u32 2, %v22_v9  ;;  %v38_v14 = vmul.u32 2, %v23_v10 }
   0xb   :  { %p263_p4 = pnand %p262_p3, %p256_p0 }
   0xc   :  { %s33_s0 = sshrl.u32 %s32_s15, 16 }
   0xd   :  { %s34_s16 = sxor.u32 %s33_s0, %s32_s15 }
   0xe   :  { %v39_v15 = vstv %s34_s16 }
   0xf   :  { %v40_v16 = vadd.s32 %v39_v15, %v35_v11  ;;  %v41_v17 = vadd.s32 %v39_v15, %v36_v12  ;;  %v42_v18 = vadd.s32 %v39_v15, %v37_v13  ;;  %v43_v19 = vadd.s32 %v39_v15, %v38_v14 }
  0x11   :  { %v44_v20 = vmul.u32 2654435769, %v40_v16  ;;  %v80_v21 = vadd.s32 1, %v40_v16  ;;  %v45_v22 = vmul.u32 2654435769, %v41_v17  ;;  %v81_v23 = vadd.s32 1, %v41_v17 }
  0x12   :  { %v46_v24 = vmul.u32 2654435769, %v42_v18  ;;  %v82_v25 = vadd.s32 1, %v42_v18  ;;  %v47_v26 = vmul.u32 2654435769, %v43_v19  ;;  %v83_v27 = vadd.s32 1, %v43_v19 }
  0x13   :  { %v48_v28 = vshrl.u32 %v44_v20, 16  ;;  %v84_v29 = vmul.u32 2654435769, %v80_v21  ;;  %v49_v30 = vshrl.u32 %v45_v22, 16  ;;  %v85_v31 = vmul.u32 2654435769, %v81_v23 }
  0x14   :  { %v50_v32 = vshrl.u32 %v46_v24, 16  ;;  %v86_v33 = vmul.u32 2654435769, %v82_v25  ;;  %v51_v34 = vshrl.u32 %v47_v26, 16  ;;  %v87_v35 = vmul.u32 2654435769, %v83_v27 }
  0x15   :  { %v52_v36 = vxor.u32 %v48_v28, %v44_v20  ;;  %v88_v37 = vshrl.u32 %v84_v29, 16  ;;  %v53_v38 = vxor.u32 %v49_v30, %v45_v22  ;;  %v89_v39 = vshrl.u32 %v85_v31, 16 }
  0x16   :  { %v54_v40 = vxor.u32 %v50_v32, %v46_v24  ;;  %v90_v41 = vshrl.u32 %v86_v33, 16  ;;  %v55_v42 = vxor.u32 %v51_v34, %v47_v26  ;;  %v91_v43 = vshrl.u32 %v87_v35, 16 }
  0x17   :  { %v56_v44 = vmul.u32 2146121005, %v52_v36  ;;  %v92_v45 = vxor.u32 %v88_v37, %v84_v29  ;;  %v57_v46 = vmul.u32 2146121005, %v53_v38  ;;  %v93_v47 = vxor.u32 %v89_v39, %v85_v31 }
  0x18   :  { %v58_v48 = vmul.u32 2146121005, %v54_v40  ;;  %v94_v49 = vxor.u32 %v90_v41, %v86_v33  ;;  %v59_v50 = vmul.u32 2146121005, %v55_v42  ;;  %v95_v51 = vxor.u32 %v91_v43, %v87_v35 }
  0x19   :  { %v60_v52 = vshrl.u32 %v56_v44, 15  ;;  %v96_v53 = vmul.u32 2146121005, %v92_v45  ;;  %v61_v54 = vshrl.u32 %v57_v46, 15  ;;  %v97_v55 = vmul.u32 2146121005, %v93_v47 }
  0x1a   :  { %v62_v56 = vshrl.u32 %v58_v48, 15  ;;  %v98_v57 = vmul.u32 2146121005, %v94_v49  ;;  %v63_v58 = vshrl.u32 %v59_v50, 15  ;;  %v99_v59 = vmul.u32 2146121005, %v95_v51 }
  0x1b   :  { %v64_v60 = vxor.u32 %v60_v52, %v56_v44  ;;  %v100_v61 = vshrl.u32 %v96_v53, 15  ;;  %v65_v62 = vxor.u32 %v61_v54, %v57_v46  ;;  %v101_v63 = vshrl.u32 %v97_v55, 15 }
  0x1c   :  { %v66_v0 = vxor.u32 %v62_v56, %v58_v48  ;;  %v102_v1 = vshrl.u32 %v98_v57, 15  ;;  %v67_v2 = vxor.u32 %v63_v58, %v59_v50  ;;  %v103_v3 = vshrl.u32 %v99_v59, 15 }
  0x1d   :  { %v68_v4 = vmul.u32 2221713035, %v64_v60  ;;  %v104_v5 = vxor.u32 %v100_v61, %v96_v53  ;;  %v69_v6 = vmul.u32 2221713035, %v65_v62  ;;  %v105_v7 = vxor.u32 %v101_v63, %v97_v55 }
  0x1e   :  { %v70_v8 = vmul.u32 2221713035, %v66_v0  ;;  %v106_v9 = vxor.u32 %v102_v1, %v98_v57  ;;  %v71_v10 = vmul.u32 2221713035, %v67_v2  ;;  %v295_v11 = vxor.u32 %v103_v3, %v99_v59 }
  0x1f   :  { %v72_v12 = vshrl.u32 %v68_v4, 16  ;;  %v108_v13 = vmul.u32 2221713035, %v104_v5  ;;  %v73_v14 = vshrl.u32 %v69_v6, 16  ;;  %v109_v15 = vmul.u32 2221713035, %v105_v7 }
  0x20   :  { %v74_v16 = vshrl.u32 %v70_v8, 16  ;;  %v110_v17 = vmul.u32 2221713035, %v106_v9  ;;  %v75_v18 = vshrl.u32 %v71_v10, 16  ;;  %v111_v19 = vmul.u32 2221713035, %v295_v11 }
  0x21   :  { %v76_v20 = vxor.u32 %v72_v12, %v68_v4  ;;  %v112_v21 = vshrl.u32 %v108_v13, 16  ;;  %v77_v22 = vxor.u32 %v73_v14, %v69_v6  ;;  %v113_v23 = vshrl.u32 %v109_v15, 16 }
  0x22   :  { %v298_v24 = vxor.u32 %v74_v16, %v70_v8  ;;  %v114_v25 = vshrl.u32 %v110_v17, 16  ;;  %v300_v26 = vxor.u32 %v75_v18, %v71_v10  ;;  %v115_v27 = vshrl.u32 %v111_v19, 16 }
  0x23   :  { %v116_v28 = vxor.u32 %v112_v21, %v108_v13  ;;  %v120_v29 = vand.u32 255, %v76_v20  ;;  %v124_v30 = vshrl.u32 %v76_v20, 8  ;;  %v136_v31 = vshrl.u32 %v76_v20, 16 }
  0x24   :  { %v148_v32 = vshrl.u32 %v76_v20, 24  ;;  %v117_v33 = vxor.u32 %v113_v23, %v109_v15  ;;  %v121_v34 = vand.u32 255, %v77_v22  ;;  %v125_v35 = vshrl.u32 %v77_v22, 8 }
  0x25   :  { %v128_v36 = vand.u32 255, %v124_v30  ;;  %v140_v37 = vand.u32 255, %v136_v31  ;;  %v156_v38 = vand.u32 255, %v116_v28  ;;  %v160_v39 = vshrl.u32 %v116_v28, 8 }
  0x26   :  { %v172_v40 = vshrl.u32 %v116_v28, 16  ;;  %v184_v41 = vshrl.u32 %v116_v28, 24  ;;  %v129_v42 = vand.u32 255, %v125_v35  ;;  %v137_v43 = vshrl.u32 %v77_v22, 16 }
  0x27   :  { %v132_v44 = vadd.s32 %v128_v36, %v120_v29  ;;  %v164_v45 = vand.u32 255, %v160_v39  ;;  %v149_v46 = vshrl.u32 %v77_v22, 24  ;;  %v157_v47 = vand.u32 255, %v117_v33 }
  0x28   :  { %v176_v48 = vand.u32 255, %v172_v40  ;;  %v133_v49 = vadd.s32 %v129_v42, %v121_v34  ;;  %v141_v50 = vand.u32 255, %v137_v43  ;;  %v161_v51 = vshrl.u32 %v117_v33, 8 }
  0x29   :  { %v144_v52 = vadd.s32 %v140_v37, %v132_v44  ;;  %v168_v53 = vadd.s32 %v164_v45, %v156_v38  ;;  %v173_v54 = vshrl.u32 %v117_v33, 16  ;;  %v185_v55 = vshrl.u32 %v117_v33, 24 }
  0x2a   :  { %v145_v56 = vadd.s32 %v141_v50, %v133_v49  ;;  %v165_v57 = vand.u32 255, %v161_v51  ;;  %v118_v58 = vxor.u32 %v114_v25, %v110_v17  ;;  %v122_v59 = vand.u32 255, %v298_v24 }
  0x2b   :  { %v152_v60 = vadd.s32 %v148_v32, %v144_v52  ;;  %v180_v61 = vadd.s32 %v176_v48, %v168_v53  ;;  %v177_v62 = vand.u32 255, %v173_v54  ;;  %v126_v63 = vshrl.u32 %v298_v24, 8 }
  0x2c   :  { %v153_v0 = vadd.s32 %v149_v46, %v145_v56  ;;  %v169_v1 = vadd.s32 %v165_v57, %v157_v47  ;;  %v138_v2 = vshrl.u32 %v298_v24, 16  ;;  %v150_v3 = vshrl.u32 %v298_v24, 24 }
  0x2d   :  { %v188_v4 = vadd.s32 %v184_v41, %v180_v61  ;;  %v130_v5 = vand.u32 255, %v126_v63  ;;  %v158_v6 = vand.u32 255, %v118_v58  ;;  %v162_v7 = vshrl.u32 %v118_v58, 8 }
  0x2e   :  { %v181_v8 = vadd.s32 %v177_v62, %v169_v1  ;;  %v142_v9 = vand.u32 255, %v138_v2  ;;  %v174_v10 = vshrl.u32 %v118_v58, 16  ;;  %v186_v11 = vshrl.u32 %v118_v58, 24 }
  0x2f   :  { %v192_v12 = vadd.s32 %v188_v4, %v152_v60  ;;  %v134_v13 = vadd.s32 %v130_v5, %v122_v59  ;;  %v166_v14 = vand.u32 255, %v162_v7  ;;  %v119_v15 = vxor.u32 %v115_v27, %v111_v19 }
  0x30   :  { %v189_v16 = vadd.s32 %v185_v55, %v181_v8  ;;  %v178_v17 = vand.u32 255, %v174_v10  ;;  %v123_v18 = vand.u32 255, %v300_v26  ;;  %v127_v20 = vshrl.u32 %v300_v26, 8 }
  0x31   :  { %v196_v21 = vshrl.u32 %v192_v12, 16  ;;  %v197_v22 = vand.u32 65535, %v192_v12  ;;  %v146_v23 = vadd.s32 %v142_v9, %v134_v13  ;;  %v170_v24 = vadd.s32 %v166_v14, %v158_v6 }
  0x32   :  { %v193_v25 = vadd.s32 %v189_v16, %v153_v0  ;;  %v131_v28 = vand.u32 255, %v127_v20  ;;  %v139_v29 = vshrl.u32 %v300_v26, 16  ;;  %v151_v30 = vshrl.u32 %v300_v26, 24 }
  0x33   :  { %v198_v31 = vcvt.s32.f32 %v196_v21  ;;  %v200_v32 = vcvt.s32.f32 %v197_v22  ;;  %v154_v33 = vadd.s32 %v150_v3, %v146_v23  ;;  %v182_v19 = vadd.s32 %v178_v17, %v170_v24 }
  0x34   :  { %v202_v27 = vshrl.u32 %v193_v25, 16  ;;  %v203_v34 = vand.u32 65535, %v193_v25  ;;  %v135_v35 = vadd.s32 %v131_v28, %v123_v18  ;;  %v143_v36 = vand.u32 255, %v139_v29 }
  0x35   :  { %v199_v37 = vmul.f32 65536.0, %v198_v31  ;;  %v190_v38 = vadd.s32 %v186_v11, %v182_v19  ;;  %v159_v39 = vand.u32 255, %v119_v15  ;;  %v163_v40 = vshrl.u32 %v119_v15, 8 }
  0x36   :  { %v204_v41 = vcvt.s32.f32 %v202_v27  ;;  %v206_v42 = vcvt.s32.f32 %v203_v34  ;;  %v147_v43 = vadd.s32 %v143_v36, %v135_v35  ;;  %v175_v44 = vshrl.u32 %v119_v15, 16 }
  0x37   :  { %v201_v45 = vadd.f32 %v200_v32, %v199_v37  ;;  %v194_v46 = vadd.s32 %v190_v38, %v154_v33  ;;  %v167_v47 = vand.u32 255, %v163_v40  ;;  %v187_v49 = vshrl.u32 %v119_v15, 24 }
  0x38   :  { %v205_v26 = vmul.f32 65536.0, %v204_v41  ;;  %v179_v48 = vand.u32 255, %v175_v44  ;;  %v155_v55 = vadd.s32 %v151_v30, %v147_v43 }
  0x39   :  { %v248_v50 = vadd.f32 -1020.0, %v201_v45  ;;  %v208_v51 = vshrl.u32 %v194_v46, 16  ;;  %v209_v52 = vand.u32 65535, %v194_v46  ;;  %v171_v53 = vadd.s32 %v167_v47, %v159_v39 }
  0x3a   :  { %v207_v54 = vadd.f32 %v206_v42, %v205_v26 }
  0x3b   :  { %v224_v56 = vmul.f32 0.004784196, %v248_v50  ;;  %v210_v57 = vcvt.s32.f32 %v208_v51  ;;  %v212_v58 = vcvt.s32.f32 %v209_v52  ;;  %v183_v59 = vadd.s32 %v179_v48, %v171_v53 }
  0x3c   :  { %v249_v60 = vadd.f32 -1020.0, %v207_v54 }
  0x3d   :  { %228 = vst [vmem:[#allocation4] sm:$0xff] %v224_v56  ;;  %v211_v61 = vmul.f32 65536.0, %v210_v57  ;;  %v191_v62 = vadd.s32 %v187_v49, %v183_v59 }
  0x3e   :  { %v225_v63 = vmul.f32 0.004784196, %v249_v60 }
  0x3f   :  { %v213_v0 = vadd.f32 %v212_v58, %v211_v61  ;;  %v195_v1 = vadd.s32 %v191_v62, %v155_v55 }
  0x40   :  { %229 = vst [vmem:[#allocation4 + $0x8] sm:$0xff] %v225_v63 }
  0x41   :  { %v250_v2 = vadd.f32 -1020.0, %v213_v0  ;;  %v214_v3 = vshrl.u32 %v195_v1, 16  ;;  %v215_v4 = vand.u32 65535, %v195_v1 }
  0x43   :  { %v226_v5 = vmul.f32 0.004784196, %v250_v2  ;;  %v216_v6 = vcvt.s32.f32 %v214_v3  ;;  %v218_v7 = vcvt.s32.f32 %v215_v4 }
  0x45   :  { %230 = vst [vmem:[#allocation4 + $0x10] sm:$0xff] %v226_v5  ;;  %v217_v8 = vmul.f32 65536.0, %v216_v6 }
  0x47   :  { %v219_v9 = vadd.f32 %v218_v7, %v217_v8 }
  0x49   :  { %v251_v10 = vadd.f32 -1020.0, %v219_v9 }
  0x4b   :  { %v227_v11 = vmul.f32 0.004784196, %v251_v10 }
  0x4d   :  { %231 = vst [vmem:[#allocation4 + $0x18] sm:$0xff] %v227_v11 }
  0x4e   :  { %266 = shalt.err (!%p263_p4)
}
  0x4f   :  { %s267_s22 = scalar_lea.hbm %s323_s1, 512 }
  0x50   :  { %p268_p5 = scmp.ne.s32.totalorder %s323_s1, %s267_s22  ;;  %p271_p6 = scmp.lt.u32.totalorder %s267_s22, %s323_s1 }
  0x52   :  { %p273_p7 = pnand %p271_p6, %p268_p5 }
  0x54   :  { %276 = shalt.err (!%p273_p7)
}
  0x55   :  { %s280_s27 = smov 256   ;;  %s281_s28 = smov 16  }
  0x56   :  { %243 = dma.vmem_to_hbm [thread:$0]  %s238_s18, 512, %s323_s1, [#allocation5], %s280_s27, %s280_s27, %s281_s28  }
  0x57   :  { %277 = dma.done.wait [#allocation5], 512  }
  0x58   :  { %278 = vsyncadd [#allocation5], 4294966784 }
  0x59   :  { %247 = vsyncpa [#allocation5], 1 }

</bundles_post_ra>
